<compile_context>
chip_gen: v6e
topology: v6e:2x2x1
jax: 0.10.0
libtpu: 0.0.40
codegen_flags: <defaults>
</compile_context>

<pallas_src>
import functools

import jax
import jax.numpy as jnp
from jax.experimental import pallas as pl
from jax.experimental.pallas import tpu as pltpu

_LANE = 128
_EPS = 1e-5
_NEG_SLOPE = 0.2
_VMEM_LIMIT = 32 * 1024 * 1024
_FUSED_Y_BYTES_CAP = 16 * 1024 * 1024      # VMEM budget for the resident y scratch
_PATCH_BLOCK_BYTES_CAP = 2 * 1024 * 1024   # per patch-tile VMEM budget


def _round_up(x, m):
    return (x + m - 1) // m * m


# ----------------- fused single-call path (y resident in VMEM) ---------------

def _fused_kernel(w_ref, gb_ref, p_ref, o_ref,
                  y_scr, sum_scr, sumsq_scr, scale_scr, shift_scr, *,
                  n_hw, inv_count, eps, neg_slope):
    # w_ref:  [C_out, K_pad] bf16 (resident)
    # gb_ref: [C_out, 2]     f32  (col 0: gamma, col 1: beta; resident)
    # p_ref:  [K_pad, t_hw]  bf16 (patch tile; pinned to block 0 during phase 1)
    # o_ref:  [1, C_out, t_hw] f32 (per-image NCHW output tile)
    phase = pl.program_id(0)
    n = pl.program_id(1)
    j = pl.program_id(2)
    t = n * n_hw + j                                   # flat tile id

    @pl.when((phase == 0) & (t == 0))
    def _():
        sum_scr[...] = jnp.zeros_like(sum_scr)
        sumsq_scr[...] = jnp.zeros_like(sumsq_scr)

    @pl.when(phase == 0)
    def _():
        y = jnp.dot(w_ref[...], p_ref[...], preferred_element_type=jnp.float32)
        y_scr[t] = y                                   # keep pre-BN act in VMEM
        sum_scr[...] += jnp.sum(y, axis=1, keepdims=True)
        sumsq_scr[...] += jnp.sum(y * y, axis=1, keepdims=True)

    @pl.when((phase == 1) & (t == 0))
    def _():
        mean = sum_scr[...] * inv_count
        var = jnp.maximum(sumsq_scr[...] * inv_count - mean * mean, 0.0)
        scale = gb_ref[:, 0:1] * jax.lax.rsqrt(var + eps)
        scale_scr[...] = scale
        shift_scr[...] = gb_ref[:, 1:2] - mean * scale

    @pl.when(phase == 1)
    def _():
        z = y_scr[t] * scale_scr[...] + shift_scr[...]          # lane-broadcast
        o_ref[0] = jnp.where(z >= 0, z, neg_slope * z).astype(o_ref.dtype)


# -------------------- two-pass fallback (y staged via HBM) -------------------

def _conv_stats_kernel(w_ref, p_ref, y_ref, sum_ref, sumsq_ref):
    n = pl.program_id(0)
    j = pl.program_id(1)

    @pl.when((n == 0) & (j == 0))
    def _():
        sum_ref[...] = jnp.zeros_like(sum_ref)
        sumsq_ref[...] = jnp.zeros_like(sumsq_ref)

    y = jnp.dot(w_ref[...], p_ref[...], preferred_element_type=jnp.float32)
    y_ref[0] = y.astype(y_ref.dtype)                   # bf16 staging (half traffic)
    sum_ref[...] += jnp.sum(y, axis=1, keepdims=True)
    sumsq_ref[...] += jnp.sum(y * y, axis=1, keepdims=True)


def _bn_lrelu_kernel(ss_ref, y_ref, o_ref, *, neg_slope):
    # ss_ref: [C_out, 2] f32 precomputed (scale, shift)
    z = y_ref[0].astype(jnp.float32) * ss_ref[:, 0:1] + ss_ref[:, 1:2]
    o_ref[0] = jnp.where(z >= 0, z, neg_slope * z).astype(o_ref.dtype)


# ---------------------------------- wrapper ----------------------------------

def encode_block_forward(x_nchw, weight, bias, gamma, beta, *, stride, padding,
                         eps=_EPS, negative_slope=_NEG_SLOPE):
    """x_nchw: [N,Cin,H,W]; weight: [Cout,Cin,kH,kW] (PyTorch layouts)."""
    del bias  # exactly cancelled by the training-mode BatchNorm batch mean
    N, C_in, H, W = x_nchw.shape
    C_out, _, kH, kW = weight.shape
    H_out = (H + 2 * padding - kH) // stride + 1
    W_out = (W + 2 * padding - kW) // stride + 1
    HoWo = H_out * W_out
    M = N * HoWo
    K = kH * kW * C_in

    # K is the full sublane extent of the patch blocks and the full lane extent
    # of the weight block, so padding only to the bf16 sublane quantum (16) is
    # legal and ~2.7x cheaper than padding to 128.
    K_pad = _round_up(K, 16)

    # Lane-dense per-image tile, as large as a few MiB of patch VMEM allows.
    t_cap = max(_LANE, (_PATCH_BLOCK_BYTES_CAP // (K_pad * 2)) // _LANE * _LANE)
    t_hw = min(4096, t_cap, _round_up(HoWo, _LANE))
    HoWo_pad = _round_up(HoWo, t_hw)
    n_hw = HoWo_pad // t_hw

    # ---- glue (plain JAX): NHWC + zero-pad + transposed im2col [K, N, HoWo] --
    x = jnp.transpose(x_nchw, (0, 2, 3, 1))
    xp = jnp.pad(x, ((0, 0), (padding, padding), (padding, padding), (0, 0)))
    patches = []
    for kh in range(kH):
        for kw in range(kW):
            patches.append(xp[:, kh:kh + H_out * stride:stride,
                               kw:kw + W_out * stride:stride, :])   # [N,Ho,Wo,Cin]
    pm = jnp.stack(patches, axis=0)                                 # [kHkW,N,Ho,Wo,Cin]
    pm = jnp.transpose(pm, (0, 4, 1, 2, 3)).reshape(K, N, HoWo)     # k = (kh,kw,cin)

    # Zero padding is exact: padded patch columns give y == 0 (no conv bias),
    # adding 0 to both BN accumulators; mean/var divide by the true M.
    p_t = jnp.pad(pm, ((0, K_pad - K), (0, 0), (0, HoWo_pad - HoWo))
                  ).astype(jnp.bfloat16).reshape(K_pad, N * HoWo_pad)
    w_t = jnp.pad(jnp.transpose(weight, (0, 2, 3, 1)).reshape(C_out, K),
                  ((0, 0), (0, K_pad - K))).astype(jnp.bfloat16)

    inv_count = 1.0 / M
    y_bytes = N * C_out * HoWo_pad * 4
    matmul_flops = 2 * N * HoWo_pad * K_pad * C_out
    p_bytes = K_pad * N * HoWo_pad * 2
    out_bytes = N * C_out * HoWo_pad * 4

    if y_bytes <= _FUSED_Y_BYTES_CAP:
        # --- fused: phase 0 = conv + stats into VMEM, phase 1 = BN + LReLU ---
        gb = jnp.stack([gamma.astype(jnp.float32), beta.astype(jnp.float32)],
                       axis=1)
        kernel = functools.partial(_fused_kernel, n_hw=n_hw, inv_count=inv_count,
                                   eps=eps, neg_slope=negative_slope)
        out_p = pl.pallas_call(
            kernel,
            out_shape=jax.ShapeDtypeStruct((N, C_out, HoWo_pad), jnp.float32),
            grid=(2, N, n_hw),
            in_specs=[
                pl.BlockSpec((C_out, K_pad), lambda ph, n, j: (0, 0)),
                pl.BlockSpec((C_out, 2), lambda ph, n, j: (0, 0)),
                # Patch tile: streamed in phase 0, pinned to block 0 in phase 1
                # so it is not re-fetched.
                pl.BlockSpec((K_pad, t_hw),
                             lambda ph, n, j: (0, (n * n_hw + j) * (1 - ph))),
            ],
            # Output pinned to block 0 during phase 0 (never written there, so
            # nothing is flushed); phase 1 writes every block exactly once.
            out_specs=pl.BlockSpec((1, C_out, t_hw),
                                   lambda ph, n, j: (n * ph, 0, j * ph)),
            scratch_shapes=[
                pltpu.VMEM((N * n_hw, C_out, t_hw), jnp.float32),  # resident y
                pltpu.VMEM((C_out, 1), jnp.float32),               # sum
                pltpu.VMEM((C_out, 1), jnp.float32),               # sum of squares
                pltpu.VMEM((C_out, 1), jnp.float32),               # scale
                pltpu.VMEM((C_out, 1), jnp.float32),               # shift
            ],
            compiler_params=pltpu.CompilerParams(
                dimension_semantics=("arbitrary", "arbitrary", "arbitrary"),
                vmem_limit_bytes=_VMEM_LIMIT),
            cost_estimate=pl.CostEstimate(
                flops=matmul_flops + 4 * N * HoWo_pad * C_out,
                transcendentals=C_out,
                bytes_accessed=p_bytes + C_out * K_pad * 2 + out_bytes),
        )(w_t, gb, p_t)
    else:
        # --- fallback: two passes, y staged through HBM in bf16 ---
        y_t, y_sum, y_sumsq = pl.pallas_call(
            _conv_stats_kernel,
            out_shape=(jax.ShapeDtypeStruct((N, C_out, HoWo_pad), jnp.bfloat16),
                       jax.ShapeDtypeStruct((C_out, 1), jnp.float32),
                       jax.ShapeDtypeStruct((C_out, 1), jnp.float32)),
            grid=(N, n_hw),
            in_specs=[pl.BlockSpec((C_out, K_pad), lambda n, j: (0, 0)),
                      pl.BlockSpec((K_pad, t_hw),
                                   lambda n, j: (0, n * n_hw + j))],
            out_specs=(pl.BlockSpec((1, C_out, t_hw), lambda n, j: (n, 0, j)),
                       pl.BlockSpec((C_out, 1), lambda n, j: (0, 0)),
                       pl.BlockSpec((C_out, 1), lambda n, j: (0, 0))),
            compiler_params=pltpu.CompilerParams(
                dimension_semantics=("arbitrary", "arbitrary"),
                vmem_limit_bytes=_VMEM_LIMIT),
            cost_estimate=pl.CostEstimate(
                flops=matmul_flops, transcendentals=0,
                bytes_accessed=(p_bytes + C_out * K_pad * 2
                                + N * C_out * HoWo_pad * 2 + 2 * C_out * 4)),
        )(w_t, p_t)

        # [C_out]-wide BN math in glue (negligible); pass 2 is pure FMA+select.
        mean = y_sum[:, 0] * inv_count
        var = jnp.maximum(y_sumsq[:, 0] * inv_count - mean * mean, 0.0)
        scale = gamma.astype(jnp.float32) * jax.lax.rsqrt(var + eps)
        shift = beta.astype(jnp.float32) - mean * scale
        ss = jnp.stack([scale, shift], axis=1)                      # [C_out, 2]

        kernel2 = functools.partial(_bn_lrelu_kernel, neg_slope=negative_slope)
        out_p = pl.pallas_call(
            kernel2,
            out_shape=jax.ShapeDtypeStruct((N, C_out, HoWo_pad), jnp.float32),
            grid=(N, n_hw),
            in_specs=[pl.BlockSpec((C_out, 2), lambda n, j: (0, 0)),
                      pl.BlockSpec((1, C_out, t_hw), lambda n, j: (n, 0, j))],
            out_specs=pl.BlockSpec((1, C_out, t_hw), lambda n, j: (n, 0, j)),
            compiler_params=pltpu.CompilerParams(
                dimension_semantics=("parallel", "parallel"),
                vmem_limit_bytes=_VMEM_LIMIT),
            cost_estimate=pl.CostEstimate(
                flops=4 * N * HoWo_pad * C_out, transcendentals=0,
                bytes_accessed=N * C_out * HoWo_pad * (2 + 4)),
        )(ss, y_t)

    # Already NCHW-ordered: just drop per-image padding (no transpose needed).
    return out_p[:, :, :HoWo].reshape(N, C_out, H_out, W_out)


def _reference_forward(x, weight, bias, gamma, beta, *, stride, padding,
                       eps=_EPS, negative_slope=_NEG_SLOPE):
    y = jax.lax.conv_general_dilated(
        x, weight, window_strides=(stride, stride),
        padding=[(padding, padding), (padding, padding)],
        dimension_numbers=("NCHW", "OIHW", "NCHW"))
    y = y + bias[None, :, None, None]
    mean = jnp.mean(y, axis=(0, 2, 3), keepdims=True)
    var = jnp.mean((y - mean) ** 2, axis=(0, 2, 3), keepdims=True)
    z = ((y - mean) * jax.lax.rsqrt(var + eps) * gamma[None, :, None, None]
         + beta[None, :, None, None])
    return jnp.where(z >= 0, z, negative_slope * z)


if __name__ == "__main__":
    # encode_block(in_channel=4, out_channel=8, kernel_size=3, stride=2, padding=1)
    in_channel, out_channel, kernel_size, stride, padding = 4, 8, 3, 2, 1
    N, H, W = 2, 16, 16

    key = jax.random.PRNGKey(0)
    kx, kw, kb = jax.random.split(key, 3)

    x = jax.random.normal(kx, (N, in_channel, H, W), dtype=jnp.float32)
    fan_in = in_channel * kernel_size * kernel_size
    bound = 1.0 / (fan_in ** 0.5)
    weight = jax.random.uniform(
        kw, (out_channel, in_channel, kernel_size, kernel_size),
        minval=-bound, maxval=bound, dtype=jnp.float32)
    bias = jax.random.uniform(kb, (out_channel,), minval=-bound, maxval=bound,
                              dtype=jnp.float32)
    gamma = jnp.ones((out_channel,), dtype=jnp.float32)
    beta = jnp.zeros((out_channel,), dtype=jnp.float32)

    fwd = jax.jit(functools.partial(encode_block_forward,
                                    stride=stride, padding=padding))
    out = fwd(x, weight, bias, gamma, beta)
    jax.block_until_ready(out)

    assert out.shape == (N, out_channel, 8, 8), out.shape
    assert bool(jnp.all(jnp.isfinite(out)))

    ref = _reference_forward(x, weight, bias, gamma, beta,
                             stride=stride, padding=padding)
    err = float(jnp.max(jnp.abs(out - ref)))
    assert err < 0.15, f"max abs error vs reference too large: {err}"
    print("KERNEL_OK")
</pallas_src>

<mosaic_0001>
module attributes {stable_mosaic.version = 11 : i64} {
  func.func @_fused_kernel(%arg0: i32, %arg1: i32, %arg2: i32, %arg3: memref<8x48xbf16, #tpu.memory_space<vmem>>, %arg4: memref<8x2xf32, #tpu.memory_space<vmem>>, %arg5: memref<48x128xbf16, #tpu.memory_space<vmem>>, %arg6: memref<1x8x128xf32, #tpu.memory_space<vmem>>, %arg7: memref<2x8x128xf32, #tpu.memory_space<vmem>>, %arg8: memref<8x1xf32, #tpu.memory_space<vmem>>, %arg9: memref<8x1xf32, #tpu.memory_space<vmem>>, %arg10: memref<8x1xf32, #tpu.memory_space<vmem>>, %arg11: memref<8x1xf32, #tpu.memory_space<vmem>>) attributes {dimension_semantics = [#tpu.dimension_semantics<arbitrary>, #tpu.dimension_semantics<arbitrary>, #tpu.dimension_semantics<arbitrary>], iteration_bounds = array<i64: 2, 2, 1>, scalar_prefetch = 0 : i64, scratch_operands = 5 : i64, tpu.core_type = #tpu.core_type<tc>, window_params = [{pipeline_mode = #tpu.pipeline_mode<synchronous>, transform_indices = @transform_0, window_bounds = array<i64: 8, 48>}, {pipeline_mode = #tpu.pipeline_mode<synchronous>, transform_indices = @transform_1, window_bounds = array<i64: 8, 2>}, {transform_indices = @transform_2, window_bounds = array<i64: 48, 128>}, {transform_indices = @transform_3, window_bounds = array<i64: 1, 8, 128>}]} {
    %c1_i32 = arith.constant 1 : i32
    %0 = arith.muli %arg1, %c1_i32 : i32
    %1 = arith.addi %0, %arg2 : i32
    %c0_i32 = arith.constant 0 : i32
    %2 = arith.cmpi eq, %arg0, %c0_i32 : i32
    %c0_i32_0 = arith.constant 0 : i32
    %3 = arith.cmpi eq, %1, %c0_i32_0 : i32
    %4 = arith.andi %2, %3 : i1
    %5 = arith.extui %4 : i1 to i32
    %c0_i32_1 = arith.constant 0 : i32
    %6 = arith.cmpi ne, %5, %c0_i32_1 : i32
    scf.if %6 {
      %cst = arith.constant 0.000000e+00 : f32
      %18 = vector.broadcast %cst : f32 to vector<8x1xf32>
      %c0 = arith.constant 0 : index
      %c0_9 = arith.constant 0 : index
      %19 = vector.load %arg8[%c0, %c0_9] : memref<8x1xf32, #tpu.memory_space<vmem>>, vector<8x1xf32>
      tpu.vector_store %arg8[%c0, %c0_9], %18 {strides = array<i32>} : memref<8x1xf32, #tpu.memory_space<vmem>>, vector<8x1xf32>,
      %cst_10 = arith.constant 0.000000e+00 : f32
      %20 = vector.broadcast %cst_10 : f32 to vector<8x1xf32>
      %c0_11 = arith.constant 0 : index
      %c0_12 = arith.constant 0 : index
      %21 = vector.load %arg9[%c0_11, %c0_12] : memref<8x1xf32, #tpu.memory_space<vmem>>, vector<8x1xf32>
      tpu.vector_store %arg9[%c0_11, %c0_12], %20 {strides = array<i32>} : memref<8x1xf32, #tpu.memory_space<vmem>>, vector<8x1xf32>,
    } else {
    }
    %c0_i32_2 = arith.constant 0 : i32
    %7 = arith.cmpi eq, %arg0, %c0_i32_2 : i32
    %8 = arith.extui %7 : i1 to i32
    %c0_i32_3 = arith.constant 0 : i32
    %9 = arith.cmpi ne, %8, %c0_i32_3 : i32
    scf.if %9 {
      %c0 = arith.constant 0 : index
      %c0_9 = arith.constant 0 : index
      %18 = vector.load %arg3[%c0, %c0_9] : memref<8x48xbf16, #tpu.memory_space<vmem>>, vector<8x48xbf16>
      %c0_10 = arith.constant 0 : index
      %c0_11 = arith.constant 0 : index
      %19 = vector.load %arg5[%c0_10, %c0_11] : memref<48x128xbf16, #tpu.memory_space<vmem>>, vector<48x128xbf16>
      %cst = arith.constant dense<0.000000e+00> : vector<8x128xf32>
      %20 = tpu.matmul %18, %19, %cst {dimension_numbers = #tpu.dot_dimension_numbers<[1], [0], [0], [1], [0, 0, 1, 1], [], []>} : vector<8x48xbf16>, vector<48x128xbf16>, vector<8x128xf32> -> vector<8x128xf32>
      %21 = arith.index_cast %1 : i32 to index
      %c0_12 = arith.constant 0 : index
      %c0_13 = arith.constant 0 : index
      %22 = vector.load %arg7[%21, %c0_12, %c0_13] : memref<2x8x128xf32, #tpu.memory_space<vmem>>, vector<1x8x128xf32>
      %23 = vector.shape_cast %22 : vector<1x8x128xf32> to vector<8x128xf32>
      %24 = vector.shape_cast %20 : vector<8x128xf32> to vector<1x8x128xf32>
      tpu.vector_store %arg7[%21, %c0_12, %c0_13], %24 {strides = array<i32>} : memref<2x8x128xf32, #tpu.memory_space<vmem>>, vector<1x8x128xf32>,
      %c0_14 = arith.constant 0 : index
      %c0_15 = arith.constant 0 : index
      %25 = vector.load %arg8[%c0_14, %c0_15] : memref<8x1xf32, #tpu.memory_space<vmem>>, vector<8x1xf32>
      %cst_16 = arith.constant dense<0.000000e+00> : vector<8xf32>
      %26 = vector.multi_reduction <add>, %20, %cst_16 [1] : vector<8x128xf32> to vector<8xf32>
      %27 = vector.shape_cast %26 : vector<8xf32> to vector<8x1xf32>
      %28 = arith.addf %25, %27 : vector<8x1xf32>
      %c0_17 = arith.constant 0 : index
      %c0_18 = arith.constant 0 : index
      %29 = vector.load %arg8[%c0_17, %c0_18] : memref<8x1xf32, #tpu.memory_space<vmem>>, vector<8x1xf32>
      tpu.vector_store %arg8[%c0_17, %c0_18], %28 {strides = array<i32>} : memref<8x1xf32, #tpu.memory_space<vmem>>, vector<8x1xf32>,
      %c0_19 = arith.constant 0 : index
      %c0_20 = arith.constant 0 : index
      %30 = vector.load %arg9[%c0_19, %c0_20] : memref<8x1xf32, #tpu.memory_space<vmem>>, vector<8x1xf32>
      %31 = arith.mulf %20, %20 : vector<8x128xf32>
      %cst_21 = arith.constant dense<0.000000e+00> : vector<8xf32>
      %32 = vector.multi_reduction <add>, %31, %cst_21 [1] : vector<8x128xf32> to vector<8xf32>
      %33 = vector.shape_cast %32 : vector<8xf32> to vector<8x1xf32>
      %34 = arith.addf %30, %33 : vector<8x1xf32>
      %c0_22 = arith.constant 0 : index
      %c0_23 = arith.constant 0 : index
      %35 = vector.load %arg9[%c0_22, %c0_23] : memref<8x1xf32, #tpu.memory_space<vmem>>, vector<8x1xf32>
      tpu.vector_store %arg9[%c0_22, %c0_23], %34 {strides = array<i32>} : memref<8x1xf32, #tpu.memory_space<vmem>>, vector<8x1xf32>,
    } else {
    }
    %c1_i32_4 = arith.constant 1 : i32
    %10 = arith.cmpi eq, %arg0, %c1_i32_4 : i32
    %c0_i32_5 = arith.constant 0 : i32
    %11 = arith.cmpi eq, %1, %c0_i32_5 : i32
    %12 = arith.andi %10, %11 : i1
    %13 = arith.extui %12 : i1 to i32
    %c0_i32_6 = arith.constant 0 : i32
    %14 = arith.cmpi ne, %13, %c0_i32_6 : i32
    scf.if %14 {
      %c0 = arith.constant 0 : index
      %c0_9 = arith.constant 0 : index
      %18 = vector.load %arg8[%c0, %c0_9] : memref<8x1xf32, #tpu.memory_space<vmem>>, vector<8x1xf32>
      %cst = arith.constant 7.812500e-03 : f32
      %19 = vector.broadcast %cst : f32 to vector<8x1xf32>
      %20 = arith.mulf %18, %19 : vector<8x1xf32>
      %c0_10 = arith.constant 0 : index
      %c0_11 = arith.constant 0 : index
      %21 = vector.load %arg9[%c0_10, %c0_11] : memref<8x1xf32, #tpu.memory_space<vmem>>, vector<8x1xf32>
      %cst_12 = arith.constant 7.812500e-03 : f32
      %22 = vector.broadcast %cst_12 : f32 to vector<8x1xf32>
      %23 = arith.mulf %21, %22 : vector<8x1xf32>
      %24 = arith.mulf %20, %20 : vector<8x1xf32>
      %25 = arith.subf %23, %24 : vector<8x1xf32>
      %cst_13 = arith.constant 0.000000e+00 : f32
      %26 = vector.broadcast %cst_13 : f32 to vector<8x1xf32>
      %27 = arith.maximumf %25, %26 : vector<8x1xf32>
      %c0_14 = arith.constant 0 : index
      %c0_15 = arith.constant 0 : index
      %28 = vector.load %arg4[%c0_14, %c0_15] : memref<8x2xf32, #tpu.memory_space<vmem>>, vector<8x1xf32>
      %cst_16 = arith.constant 9.99999974E-6 : f32
      %29 = vector.broadcast %cst_16 : f32 to vector<8x1xf32>
      %30 = arith.addf %27, %29 : vector<8x1xf32>
      %31 = math.rsqrt %30 : vector<8x1xf32>
      %32 = arith.mulf %28, %31 : vector<8x1xf32>
      %c0_17 = arith.constant 0 : index
      %c0_18 = arith.constant 0 : index
      %33 = vector.load %arg10[%c0_17, %c0_18] : memref<8x1xf32, #tpu.memory_space<vmem>>, vector<8x1xf32>
      tpu.vector_store %arg10[%c0_17, %c0_18], %32 {strides = array<i32>} : memref<8x1xf32, #tpu.memory_space<vmem>>, vector<8x1xf32>,
      %c0_19 = arith.constant 0 : index
      %c1 = arith.constant 1 : index
      %34 = vector.load %arg4[%c0_19, %c1] : memref<8x2xf32, #tpu.memory_space<vmem>>, vector<8x1xf32>
      %35 = arith.mulf %20, %32 : vector<8x1xf32>
      %36 = arith.subf %34, %35 : vector<8x1xf32>
      %c0_20 = arith.constant 0 : index
      %c0_21 = arith.constant 0 : index
      %37 = vector.load %arg11[%c0_20, %c0_21] : memref<8x1xf32, #tpu.memory_space<vmem>>, vector<8x1xf32>
      tpu.vector_store %arg11[%c0_20, %c0_21], %36 {strides = array<i32>} : memref<8x1xf32, #tpu.memory_space<vmem>>, vector<8x1xf32>,
    } else {
    }
    %c1_i32_7 = arith.constant 1 : i32
    %15 = arith.cmpi eq, %arg0, %c1_i32_7 : i32
    %16 = arith.extui %15 : i1 to i32
    %c0_i32_8 = arith.constant 0 : i32
    %17 = arith.cmpi ne, %16, %c0_i32_8 : i32
    scf.if %17 {
      %18 = arith.index_cast %1 : i32 to index
      %c0 = arith.constant 0 : index
      %c0_9 = arith.constant 0 : index
      %19 = vector.load %arg7[%18, %c0, %c0_9] : memref<2x8x128xf32, #tpu.memory_space<vmem>>, vector<1x8x128xf32>
      %20 = vector.shape_cast %19 : vector<1x8x128xf32> to vector<8x128xf32>
      %c0_10 = arith.constant 0 : index
      %c0_11 = arith.constant 0 : index
      %21 = vector.load %arg10[%c0_10, %c0_11] : memref<8x1xf32, #tpu.memory_space<vmem>>, vector<8x1xf32>
      %22 = vector.broadcast %21 : vector<8x1xf32> to vector<8x128xf32>
      %23 = arith.mulf %20, %22 : vector<8x128xf32>
      %c0_12 = arith.constant 0 : index
      %c0_13 = arith.constant 0 : index
      %24 = vector.load %arg11[%c0_12, %c0_13] : memref<8x1xf32, #tpu.memory_space<vmem>>, vector<8x1xf32>
      %25 = vector.broadcast %24 : vector<8x1xf32> to vector<8x128xf32>
      %26 = arith.addf %23, %25 : vector<8x128xf32>
      %cst = arith.constant 0.000000e+00 : f32
      %27 = vector.broadcast %cst : f32 to vector<8x128xf32>
      %28 = arith.cmpf oge, %26, %27 : vector<8x128xf32>
      %cst_14 = arith.constant 2.000000e-01 : f32
      %29 = vector.broadcast %cst_14 : f32 to vector<8x128xf32>
      %30 = arith.mulf %29, %26 : vector<8x128xf32>
      %31 = arith.select %28, %26, %30 : vector<8x128xi1>, vector<8x128xf32>
      %c0_15 = arith.constant 0 : index
      %c0_16 = arith.constant 0 : index
      %c0_17 = arith.constant 0 : index
      %32 = vector.load %arg6[%c0_15, %c0_16, %c0_17] : memref<1x8x128xf32, #tpu.memory_space<vmem>>, vector<1x8x128xf32>
      %33 = vector.shape_cast %32 : vector<1x8x128xf32> to vector<8x128xf32>
      %34 = vector.shape_cast %31 : vector<8x128xf32> to vector<1x8x128xf32>
      tpu.vector_store %arg6[%c0_15, %c0_16, %c0_17], %34 {strides = array<i32>} : memref<1x8x128xf32, #tpu.memory_space<vmem>>, vector<1x8x128xf32>,
    } else {
    }
    return
  }
  func.func @transform_0(%arg0: i32, %arg1: i32, %arg2: i32) -> (i32, i32) {
    %c0_i32 = arith.constant 0 : i32
    %c0_i32_0 = arith.constant 0 : i32
    %c0_i32_1 = arith.constant 0 : i32
    return %c0_i32, %c0_i32_0 : i32, i32
  }
  func.func @transform_1(%arg0: i32, %arg1: i32, %arg2: i32) -> (i32, i32) {
    %c0_i32 = arith.constant 0 : i32
    %c0_i32_0 = arith.constant 0 : i32
    %c0_i32_1 = arith.constant 0 : i32
    return %c0_i32, %c0_i32_0 : i32, i32
  }
  func.func @transform_2(%arg0: i32, %arg1: i32, %arg2: i32) -> (i32, i32) {
    %c1_i32 = arith.constant 1 : i32
    %0 = arith.muli %arg1, %c1_i32 : i32
    %1 = arith.addi %0, %arg2 : i32
    %c1_i32_0 = arith.constant 1 : i32
    %2 = arith.subi %c1_i32_0, %arg0 : i32
    %3 = arith.muli %1, %2 : i32
    %c0_i32 = arith.constant 0 : i32
    %c0_i32_1 = arith.constant 0 : i32
    return %c0_i32, %3 : i32, i32
  }
  func.func @transform_3(%arg0: i32, %arg1: i32, %arg2: i32) -> (i32, i32, i32) {
    %0 = arith.muli %arg1, %arg0 : i32
    %1 = arith.muli %arg2, %arg0 : i32
    %c0_i32 = arith.constant 0 : i32
    %c0_i32_0 = arith.constant 0 : i32
    return %0, %c0_i32, %1 : i32, i32, i32
  }
}

</mosaic_0001>

<bundles_post_ra>
// kernel: encode_block_forward.1
= control target key start
LH: loop header
LB: loop body
LE: loop exit
PB: predicated region body
PF: predicated region fallthrough
CT: control target
= control target key end

     0   :  { %s712_s12 = smov 0   ;;  %s714_s13 = smov 0   ;;  %s819_s0 = inlined_call_operand.vmem [shape: bf16[8,48], index: 0, kind: input, shape index: {}]   ;;  %s820_s1 = inlined_call_operand.vmem [shape: f32[8,2], index: 1, kind: input, shape index: {}]   ;;  %s821_s2 = inlined_call_operand.vmem [shape: bf16[48,256], index: 2, kind: input, shape index: {}]   ;;  %s822_s3 = inlined_call_operand.vmem [shape: f32[2,8,128], index: 3, kind: output, shape index: {}]  }
   0x1   :  { %s716_s14 = smov 0   ;;  %s718_s15 = smov 0  }
   0x2   :  { %s720_s16 = smov 0   ;;  %s722_s17 = smov 0  }
   0x3   :  { %s724_s18 = smov 0  }
   0x4 LB: > { %s28_s19 = sadd.s32 1, %s676_s16  ;;  %s32_s20 = sadd.s32 1, %s680_s17  ;;  %s684_s18 = sphi %s724_s18, %s13_s18   ;;  %s680_s17 = sphi %s722_s17, %s828_s17   ;;  %s676_s16 = sphi %s720_s16, %s827_s16   ;;  %s672_s15 = sphi %s718_s15, %s826_s15   ;;  %s668_s14 = sphi %s716_s14, %s825_s14   ;;  %s664_s13 = sphi %s714_s13, %s824_s13   ;;  %s660_s12 = sphi %s712_s12, %s823_s12  }
   0x5   : > { %p30_p0 = scmp.ge.s32.totalorder %s28_s19, 2  ;;  %p94_p1 = scmp.ne.s32.totalorder %s664_s13, %s660_s12 }
   0x6   : > { %p95_p2 = scmp.eq.s32.totalorder %s684_s18, 0  ;;  %s79_s21 = ssub.s32 1, %s680_s17 }
   0x7   : > { %s830_s19 = smov (%p30_p0, %s28_s19), 0  ;;  %s832_s20 = smov (!%p30_p0, %s32_s20), %s680_s17 }
   0x8   : > { %p34_p3 = scmp.ge.s32.totalorder %s832_s20, 2  ;;  %p96_p4 = por %p95_p2, %p94_p1 }
   0x9   : > { %s80_s22 = smul.u32 %s676_s16, %s79_s21  ;;  %s87_s26 = sadd.s32 1, %s664_s13 }
   0xa   : > { %s834_s20 = smov (%p34_p3, %s832_s20), 0  ;;  %p532_p6 = scmp.ge.s32.totalorder %s684_s18, 4 }
   0xb   : > { %s82_s23 = ssub.s32 1, %s834_s20 }
   0xc   : > { %s83_s24 = smul.u32 %s82_s23, %s830_s19 }
   0xd   : > { %158 = sbr.rel (%p532_p6) target bundleno = 26 (0x1a), region = 24 }
   0xe   : > { %s84_s25 = ssub.s32 %s80_s22, %s83_s24 }
   0xf   : > { %p85_p5 = scmp.eq.s32.totalorder %s84_s25, 0 }
  0x11   : > { %s763_s27 = scalar_select %p85_p5, %s664_s13, %s87_s26  }
  0x12   : > { %161 = sbr.rel (!%p96_p4) target bundleno = 26 (0x1a), region = 28  ;;  %s163_s28 = sand.u32 (%p96_p4), 1, %s664_s13  }
  0x13   : > { %s533_s29 = sshll.u32 (%p96_p4), %s80_s22, 2  ;;  %s560_s30 = smul.u32 (%p96_p4), 24, %s163_s28 }
  0x14   : > { %s170_s6 = scalar_lea.vmem (%p96_p4), %s821_s2, %s533_s29 }
  0x15   : > { %v187_v0 = vld [vmem:[%s170_s6] sm:$0xf] (%p96_p4)  ;;  %v189_v1 = vld [vmem:[%s170_s6 + $0x8] sm:$0xf] (%p96_p4)  ;;  %v191_v2 = vld [vmem:[%s170_s6 + $0x10] sm:$0xf] (%p96_p4) }
  0x16   : > { %v193_v3 = vld [vmem:[%s170_s6 + $0x18] sm:$0xf] (%p96_p4)  ;;  %v195_v4 = vld [vmem:[%s170_s6 + $0x20] sm:$0xf] (%p96_p4)  ;;  %s165_s7 = scalar_lea.vmem (%p96_p4), [#allocation7], %s560_s30 }
  0x17   : > { %188 = vst [vmem:[%s165_s7] sm:$0xf] %v187_v0  ;;  %190 = vst [vmem:[%s165_s7 + $0x4] sm:$0xf] %v189_v1  ;;  %v197_v5 = vld [vmem:[%s170_s6 + $0x28] sm:$0xf] }
  0x18   : > { %192 = vst [vmem:[%s165_s7 + $0x8] sm:$0xf] %v191_v2  ;;  %194 = vst [vmem:[%s165_s7 + $0xc] sm:$0xf] %v193_v3 }
  0x19   : > { %196 = vst [vmem:[%s165_s7 + $0x10] sm:$0xf] %v195_v4  ;;  %198 = vst [vmem:[%s165_s7 + $0x14] sm:$0xf] %v197_v5 }
  0x1a PF: > { %p534_p7 = scmp.ge.s32.totalorder %s684_s18, 1  ;;  %p233_p8 = scmp.lt.s32.totalorder %s684_s18, 5 }
  0x1c   : > { %p234_p9 = pnand %p534_p7, %p233_p8 }
  0x1d   : > { %s240_s8 = sand.u32 (!%p234_p9), 1, %s660_s12   ;;  %s270_s9 = smul.u32 (!%p234_p9), %s668_s14, %s672_s15 }
  0x1e   : > { %237 = sbr.rel (%p234_p9) target bundleno = 815 (0x32f), region = 69  ;;  %p283_p10 = scmp.eq.s32.totalorder (!%p234_p9), %s672_s15, 0 }
  0x1f   : > { %s561_s10 = smul.u32 (!%p234_p9), 24, %s240_s8  ;;  %p272_p11 = scmp.lt.s32.totalorder (!%p234_p9), %s270_s9, 1 }
  0x20   : > { %p284_p12 = scmp.eq.s32.totalorder (!%p234_p9), %s668_s14, 0 }
  0x21   : > { %s242_s24 = scalar_lea.vmem (!%p234_p9), [#allocation7], %s561_s10 }
  0x22   : > { %p285_p13 = pnand (!%p234_p9), %p284_p12, %p283_p10 }
  0x23   : > { %s836_s9 = smov (!%p272_p11, %s270_s9), 1 }
  0x24   : > { %s535_s11 = sshll.u32 %s836_s9, 3  ;;  %288 = sbr.rel (%p285_p13) target bundleno = 43 (0x2b), region = 77 }
  0x25   : > { %s782_s23 = scalar_lea.vmem %s822_s3, %s535_s11 }
  0x29   : > { %vm289_vm0 = vcmask 7168   ;;  %v686_v6 = vmov 0.0  }
  0x2a   : > { %290 = vst.msk [vmem:[#allocation3] sm:$0xff] %vm289_vm0, %v686_v6  ;;  %291 = vst.msk [vmem:[#allocation4] sm:$0xff] %vm289_vm0, %v686_v6 }
  0x2b PF: > { %p536_p0 = scmp.ne.s32.totalorder %s672_s15, 0 }
  0x2c   : > { %s541_s26 = sshll.u32 (!%p536_p0), %s668_s14, 3 }
  0x2d   : > { %294 = sbr.rel (%p536_p0) target bundleno = 401 (0x191), region = 81  ;;  %s365_s28 = scalar_lea.vmem (!%p536_p0), [#allocation2], %s541_s26 }
  0x32   : > { %v624_v7 = vld [vmem:[%s242_s24 + $0x10] sm:$0xff]   ;;  %v687_v8 = vmov 0.0   ;;  %v625_v9 = vld [vmem:[%s242_s24 + $0x8] sm:$0xff]   ;;  %vm688_vm1 = vmmov 0   ;;  %v626_v10 = vld [vmem:[%s242_s24] sm:$0xff]   ;;  %vm320_vm2 = vcmask 392192  }
  0x33   : > { %550 = vmatprep.subr.bf16.mxu0 %v687_v8  ;;  %556 = vmatprep.mubr.msk.bf16.mxu0 %vm688_vm1, %v687_v8  ;;  %v295_v11 = vld [vmem:[%s819_s0] sm:$0xf]  ;;  %v367_v17 = vld [vmem:[#allocation3] sm:$0xff]  ;;  %vm371_vm3 = vcmask 7168   ;;  %v373_v20 = vld [vmem:[#allocation4] sm:$0xff] }
  0x34   : > { %551 = vmatpush3.bf16.msra.mxu0 %v624_v7 }
  0x35   : > { %552 = vmatprep.subr.bf16.mxu0 %v687_v8 }
  0x38   : > { %553 = vmatpush3.bf16.msra.mxu0 %v625_v9 }
  0x39   : > { %554 = vmatprep.subr.bf16.mxu0 %v687_v8 }
  0x3c   : > { %555 = vmatpush3.bf16.msra.mxu0 %v626_v10 }
  0x3f   : > { %557 = vmatmul.mubr.msk.bf16.vlgmr.msra.gmra.mxu0 %vm320_vm2, %v295_v11 }
  0xff   : > { %v358_v12 = vpop.f32.mrf.mxu0 }
 0x100   : > { %366 = vst [vmem:[%s365_s28] sm:$0xff] %v358_v12  ;;  %368 = vadd.xlane.f32.xlu0 %v358_v12  ;;  %v374_v14 = vmul.f32 %v358_v12, %v358_v12 }
 0x101   : > { %v558_v13 = vpop.f32.mrf.mxu0 }
 0x103   : > { %v361_v15 = vpop.f32.mrf.mxu0 }
 0x104   : > { %375 = vadd.xlane.f32.xlu0 %v374_v14 }
 0x105   : > { %v559_v16 = vpop.f32.mrf.mxu0 }
 0x189   : > { %v369_v18 = vpop.xlane.xlu0 %368 }
 0x18a   : > { %v370_v19 = vadd.f32 %v369_v18, %v367_v17 }
 0x18c   : > { %372 = vst.msk [vmem:[#allocation3] sm:$0xff] %vm371_vm3, %v370_v19 }
 0x18d   : > { %v376_v21 = vpop.xlane.xlu0 %375 }
 0x18e   : > { %v377_v22 = vadd.f32 %v376_v21, %v373_v20 }
 0x190   : > { %378 = vst.msk [vmem:[#allocation4] sm:$0xff] %vm371_vm3, %v377_v22 }
 0x191 PF: > { %p379_p1 = scmp.eq.s32.totalorder %s672_s15, 1 }
 0x193   : > { %p380_p2 = pnand %p379_p1, %p284_p12 }
 0x194   : > { %s689_s4 = smov (!%p380_p2), 1   ;;  %s690_s5 = smov (!%p380_p2), 127  }
 0x195   : > { %383 = sbr.rel (%p380_p2) target bundleno = 672 (0x2a0), region = 85 }
 0x19a   : > { %v384_v23 = vld [vmem:[#allocation3] sm:$0xff]  ;;  %v386_v24 = vld [vmem:[#allocation4] sm:$0xff]  ;;  %v391_v31 = vld [vmem:[%s820_s1] sm:$0xff]  ;;  %vm395_vm4 = vcmask 7168  }
 0x19b   : > { %v385_v25 = vmul.f32 0.0078125, %v384_v23  ;;  %v387_v26 = vmul.f32 0.0078125, %v386_v24 }
 0x19d   : > { %v388_v27 = vmul.f32 %v385_v25, %v385_v25 }
 0x19f   : > { %v389_v28 = vsub.f32 %v387_v26, %v388_v27 }
 0x1a1   : > { %v390_v29 = vmax.f32 %v389_v28, 0.0 }
 0x1a3   : > { %v392_v30 = vadd.f32 1e-05, %v390_v29 }
 0x1a5   : > { %627 = vrsqrt.f32 %v392_v30 }
 0x1b2   : > { %v628_v32 = vpop.eup %627 }
 0x1b3   : > { %v394_v33 = vmul.f32 %v628_v32, %v391_v31 }
 0x1b5   : > { %v398_v34 = vmul.f32 %v394_v33, %v385_v25  ;;  %396 = vst.msk [vmem:[#allocation5] sm:$0xff] %vm395_vm4, %v394_v33 }
 0x1b7   : > { %400 = vrot.lane.b32.xlu0 %v398_v34, %s689_s4 }
 0x229   : > { %v401_v35 = vpop.permute.xlu0 %400 }
 0x22a   : > { %v403_v36 = vsub.f32 %v391_v31, %v401_v35 }
 0x22c   : > { %405 = vrot.lane.b32.xlu0 %v403_v36, %s690_s5 }
 0x29e   : > { %v406_v37 = vpop.permute.xlu0 %405 }
 0x29f   : > { %408 = vst.msk [vmem:[#allocation6] sm:$0xff] %vm395_vm4, %v406_v37 }
 0x2a0 PF: > { %p542_p3 = scmp.ne.s32.totalorder %s672_s15, 1 }
 0x2a1   : > { %s543_s6 = sshll.u32 (!%p542_p3), %s668_s14, 3 }
 0x2a2   : > { %411 = sbr.rel (%p542_p3) target bundleno = 815 (0x32f), region = 89  ;;  %s413_s7 = scalar_lea.vmem (!%p542_p3), [#allocation2], %s543_s6 }
 0x2a7   : > { %v415_v38 = vld [vmem:[#allocation5] sm:$0xff]  ;;  %v691_v39 = vmov 0   ;;  %v422_v40 = vld [vmem:[#allocation6] sm:$0xff] }
 0x2a8   : > { %629 = vset.pattern.permute.xlu0 %v691_v39  ;;  %v414_v42 = vld [vmem:[%s413_s7] sm:$0xff] }
 0x2a9   : > { %418 = vperm.xlu0 %629, %v415_v38  }
 0x2ad   : > { %425 = vperm.xlu0 %629, %v422_v40  }
 0x324   : > { %v419_v41 = vpop.permute.xlu0 %418 }
 0x325   : > { %v421_v43 = vmul.f32 %v419_v41, %v414_v42 }
 0x328   : > { %v426_v44 = vpop.permute.xlu0 %425 }
 0x329   : > { %v428_v45 = vadd.f32 %v426_v44, %v421_v43 }
 0x32b   : > { %vm429_vm5 = vcmp.ge.f32.partialorder %v428_v45, 0.0  ;;  %v430_v46 = vmul.f32 0.2, %v428_v45 }
 0x32d   : > { %v431_v47 = vsel %vm429_vm5, %v428_v45, %v430_v46 }
 0x32e   : > { %432 = vst [vmem:[%s782_s23] sm:$0xff] %v431_v47 }
 0x32f PF: > { %s13_s18 = sadd.s32 1, %s684_s18   ;;  %s823_s12 = smov %s664_s13 }
 0x330   : > { %p10_p4 = scmp.ge.s32.totalorder %s13_s18, 6   ;;  %s824_s13 = smov %s763_s27 }
 0x331   : > { %s825_s14 = smov %s676_s16  ;;  %s826_s15 = smov %s680_s17 }
 0x332   : > { %s827_s16 = smov %s830_s19  ;;  %s828_s17 = smov %s834_s20 }
 0x333   :  { %12 = sbr.rel (!%p10_p4) target bundleno = 4 (0x4), region = 126 }

</bundles_post_ra>
